<compile_context>
chip_gen: v7x
topology: tpu7x:2x2x1
jax: 0.10.0
libtpu: 0.0.40
codegen_flags: <defaults>
</compile_context>

<pallas_src>
import math

import jax
import jax.numpy as jnp
from jax.experimental import pallas as pl
from jax.experimental.pallas import tpu as pltpu


def _round_up(x, m):
    return (x + m - 1) // m * m


# ----------------------------------------------------------------------------
# Kernel: one (Cin, THW) spatial tile of one batch element, times W^T, + bias.
# ----------------------------------------------------------------------------
def _nin_kernel(x_ref, wt_ref, b_ref, o_ref):
    # x_ref : (1, C_in, THW) f32   wt_ref: (C_out, C_in) bf16
    # b_ref : (C_out, 1) f32       o_ref : (1, C_out, THW) out_dtype
    x = x_ref[0].astype(jnp.bfloat16)            # in-kernel cast: VPU has slack
    acc = jnp.dot(wt_ref[...], x, preferred_element_type=jnp.float32)
    o_ref[0] = (acc + b_ref[...]).astype(o_ref.dtype)


def _choose_hw_tile(hw_p, batch, target):
    """Lane-dense (multiple of 128) tile of the flattened H*W axis that divides
    hw_p and yields >= 2 total grid points (feeds both v7x TensorCores)."""
    thw = max(128, (min(target, hw_p) // 128) * 128)
    if batch * (hw_p // thw) < 2 and hw_p >= 256:
        thw = max(128, ((hw_p // 2) // 128) * 128)
    while hw_p % thw:            # hw_p is a multiple of 128, so this terminates
        thw -= 128
    return thw


# ----------------------------------------------------------------------------
# Wrapper: NCHW-native, no transposes / no activation repack in HBM.
# ----------------------------------------------------------------------------
def nin_forward(x_nchw, w, b, *, tile_hw=1024, out_dtype=jnp.bfloat16):
    """NIN forward.  x_nchw: (B, C_in, H, W) f32; w: (C_in, C_out); b: (C_out,)."""
    B, C_in, H, Wd = x_nchw.shape
    C_out = w.shape[1]
    HW = H * Wd

    x3 = x_nchw.reshape(B, C_in, HW)             # contiguous reshape: free
    hw_p = _round_up(HW, 128)
    if hw_p != HW:                               # only pad when H*W isn't 128-aligned
        x3 = jnp.pad(x3, ((0, 0), (0, 0), (0, hw_p - HW)))

    thw = _choose_hw_tile(hw_p, B, tile_hw)

    wt = jnp.transpose(w).astype(jnp.bfloat16)   # (C_out, C_in): tiny, one-time
    b2 = b.reshape(C_out, 1).astype(jnp.float32)

    out_bytes = jnp.dtype(out_dtype).itemsize
    cost = pl.CostEstimate(
        flops=2 * B * HW * C_in * C_out,
        transcendentals=0,
        bytes_accessed=(B * C_in * hw_p * 4          # x read (f32)
                        + C_in * C_out * 2 + C_out * 4
                        + B * C_out * hw_p * out_bytes),
    )

    out = pl.pallas_call(
        _nin_kernel,
        out_shape=jax.ShapeDtypeStruct((B, C_out, hw_p), out_dtype),
        grid_spec=pl.GridSpec(
            grid=(B, hw_p // thw),
            in_specs=[
                pl.BlockSpec((1, C_in, thw), lambda bi, j: (bi, 0, j)),  # x tile
                pl.BlockSpec((C_out, C_in), lambda bi, j: (0, 0)),       # W^T (invariant)
                pl.BlockSpec((C_out, 1), lambda bi, j: (0, 0)),          # bias (invariant)
            ],
            out_specs=pl.BlockSpec((1, C_out, thw), lambda bi, j: (bi, 0, j)),
        ),
        compiler_params=pltpu.CompilerParams(
            dimension_semantics=("parallel", "parallel"),
        ),
        cost_estimate=cost,
    )(x3, wt, b2)

    if hw_p != HW:
        out = out[:, :, :HW]
    return out.reshape(B, C_out, H, Wd)


# ----------------------------------------------------------------------------
# Deterministic parameter construction (mirrors DDPM default_init semantics)
# ----------------------------------------------------------------------------
def make_params(key, in_dim, num_units, init_scale=0.1):
    scale = 1e-10 if init_scale == 0 else init_scale
    fan_avg = (in_dim + num_units) / 2.0
    bound = math.sqrt(3.0 * scale / fan_avg)
    kw, kb = jax.random.split(key)
    w = jax.random.uniform(kw, (in_dim, num_units), jnp.float32, -bound, bound)
    # Module initializes b to zeros; use small random values here so the bias
    # path is actually exercised by the correctness check.
    b = 0.1 * jax.random.normal(kb, (num_units,), jnp.float32)
    return w, b


# ----------------------------------------------------------------------------
# Pure-JAX f32 reference (mirrors the PyTorch forward) for verification
# ----------------------------------------------------------------------------
def nin_ref(x_nchw, w, b):
    y = jnp.einsum("bchw,cd->bdhw", x_nchw, w)
    return y + b[None, :, None, None]


if __name__ == "__main__":
    key = jax.random.PRNGKey(0)
    k_x, k_p = jax.random.split(key)

    B, C_in, H, W = 2, 64, 16, 16
    num_units = 128

    x = jax.random.normal(k_x, (B, C_in, H, W), jnp.float32)
    w, b = make_params(k_p, C_in, num_units)

    out = jax.block_until_ready(nin_forward(x, w, b))

    ref = nin_ref(x, w, b)
    assert out.shape == (B, num_units, H, W)
    # bf16 MXU inputs + bf16 output with f32 accumulation: tolerance sized
    # for bf16 rounding of both the inputs and the stored result.
    max_err = float(jnp.max(jnp.abs(out.astype(jnp.float32) - ref)))
    assert max_err < 2e-2, max_err
    print("KERNEL_OK")
</pallas_src>

<mosaic_0001>
module attributes {stable_mosaic.version = 11 : i64} {
  func.func @_nin_kernel(%arg0: i32, %arg1: i32, %arg2: memref<1x64x256xf32, #tpu.memory_space<vmem>>, %arg3: memref<128x64xbf16, #tpu.memory_space<vmem>>, %arg4: memref<128x1xf32, #tpu.memory_space<vmem>>, %arg5: memref<1x128x256xbf16, #tpu.memory_space<vmem>>) attributes {dimension_semantics = [#tpu.dimension_semantics<parallel>, #tpu.dimension_semantics<parallel>], iteration_bounds = array<i64: 2, 1>, scalar_prefetch = 0 : i64, scratch_operands = 0 : i64, tpu.core_type = #tpu.core_type<tc>, window_params = [{transform_indices = @transform_0, window_bounds = array<i64: 1, 64, 256>}, {pipeline_mode = #tpu.pipeline_mode<synchronous>, transform_indices = @transform_1, window_bounds = array<i64: 128, 64>}, {pipeline_mode = #tpu.pipeline_mode<synchronous>, transform_indices = @transform_2, window_bounds = array<i64: 128, 1>}, {transform_indices = @transform_3, window_bounds = array<i64: 1, 128, 256>}]} {
    %c0 = arith.constant 0 : index
    %c0_0 = arith.constant 0 : index
    %c0_1 = arith.constant 0 : index
    %0 = vector.load %arg2[%c0, %c0_0, %c0_1] : memref<1x64x256xf32, #tpu.memory_space<vmem>>, vector<1x64x256xf32>
    %1 = vector.shape_cast %0 : vector<1x64x256xf32> to vector<64x256xf32>
    %2 = arith.truncf %1 : vector<64x256xf32> to vector<64x256xbf16>
    %c0_2 = arith.constant 0 : index
    %c0_3 = arith.constant 0 : index
    %3 = vector.load %arg3[%c0_2, %c0_3] : memref<128x64xbf16, #tpu.memory_space<vmem>>, vector<128x64xbf16>
    %cst = arith.constant dense<0.000000e+00> : vector<128x256xf32>
    %4 = tpu.matmul %3, %2, %cst {dimension_numbers = #tpu.dot_dimension_numbers<[1], [0], [0], [1], [0, 0, 1, 1], [], []>} : vector<128x64xbf16>, vector<64x256xbf16>, vector<128x256xf32> -> vector<128x256xf32>
    %c0_4 = arith.constant 0 : index
    %c0_5 = arith.constant 0 : index
    %5 = vector.load %arg4[%c0_4, %c0_5] : memref<128x1xf32, #tpu.memory_space<vmem>>, vector<128x1xf32>
    %6 = vector.broadcast %5 : vector<128x1xf32> to vector<128x256xf32>
    %7 = arith.addf %4, %6 : vector<128x256xf32>
    %8 = arith.truncf %7 : vector<128x256xf32> to vector<128x256xbf16>
    %c0_6 = arith.constant 0 : index
    %c0_7 = arith.constant 0 : index
    %c0_8 = arith.constant 0 : index
    %9 = vector.load %arg5[%c0_6, %c0_7, %c0_8] : memref<1x128x256xbf16, #tpu.memory_space<vmem>>, vector<1x128x256xbf16>
    %10 = vector.shape_cast %9 : vector<1x128x256xbf16> to vector<128x256xbf16>
    %11 = vector.shape_cast %8 : vector<128x256xbf16> to vector<1x128x256xbf16>
    tpu.vector_store %arg5[%c0_6, %c0_7, %c0_8], %11 {strides = array<i32>} : memref<1x128x256xbf16, #tpu.memory_space<vmem>>, vector<1x128x256xbf16>,
    return
  }
  func.func @transform_0(%arg0: i32, %arg1: i32) -> (i32, i32, i32) {
    %c0_i32 = arith.constant 0 : i32
    %c0_i32_0 = arith.constant 0 : i32
    return %arg0, %c0_i32, %arg1 : i32, i32, i32
  }
  func.func @transform_1(%arg0: i32, %arg1: i32) -> (i32, i32) {
    %c0_i32 = arith.constant 0 : i32
    %c0_i32_0 = arith.constant 0 : i32
    %c0_i32_1 = arith.constant 0 : i32
    return %c0_i32, %c0_i32_0 : i32, i32
  }
  func.func @transform_2(%arg0: i32, %arg1: i32) -> (i32, i32) {
    %c0_i32 = arith.constant 0 : i32
    %c0_i32_0 = arith.constant 0 : i32
    %c0_i32_1 = arith.constant 0 : i32
    return %c0_i32, %c0_i32_0 : i32, i32
  }
  func.func @transform_3(%arg0: i32, %arg1: i32) -> (i32, i32, i32) {
    %c0_i32 = arith.constant 0 : i32
    %c0_i32_0 = arith.constant 0 : i32
    return %arg0, %c0_i32, %arg1 : i32, i32, i32
  }
}

</mosaic_0001>

<bundles_post_ra>
// kernel: tpu_custom_call.1
= control target key start
LH: loop header
LB: loop body
LE: loop exit
PB: predicated region body
PF: predicated region fallthrough
CT: control target
= control target key end

     0   :  { %8 = vsyncpa [#allocation3], 0  ;;  %s1352_s0 = inlined_call_operand.hbm [shape: f32[2,64,256], index: 0, kind: input, shape index: {}]   ;;  %s1353_s1 = inlined_call_operand.vmem [shape: bf16[128,64], index: 1, kind: input, shape index: {}]   ;;  %s1354_s2 = inlined_call_operand.vmem [shape: f32[128,1], index: 2, kind: input, shape index: {}]   ;;  %s1355_s3 = inlined_call_operand.hbm [shape: bf16[2,128,256], index: 3, kind: output, shape index: {}]  }
   0x1   :  { %10 = vsyncpa [#allocation3 + $0x1], 0 }
   0x2   :  { %11 = vsyncpa [#allocation4], 0 }
   0x3   :  { %13 = vsyncpa [#allocation4 + $0x1], 0  ;;  %s1030_s12 = smov 0   ;;  %s1032_s13 = smov 0  }
   0x4   :  { %s1034_s14 = smov 0   ;;  %s1036_s15 = smov 0  }
   0x5   :  { %s1038_s16 = smov 0   ;;  %s1040_s17 = smov 0  }
   0x6 LB: > { %s739_s18 = sadd.s32 4294967295, %s1001_s17   ;;  %s740_s19 = sadd.s32 4294967294, %s1001_s17   ;;  %s1001_s17 = sphi %s1040_s17, %s19_s17   ;;  %s997_s16 = sphi %s1038_s16, %s1370_s16   ;;  %s993_s15 = sphi %s1036_s15, %s1369_s15   ;;  %s989_s14 = sphi %s1034_s14, %s1368_s14   ;;  %s985_s13 = sphi %s1032_s13, %s1367_s13   ;;  %s981_s12 = sphi %s1030_s12, %s1366_s12  }
   0x7   : > { %s31_s20 = sadd.s32 1, %s997_s16  ;;  %s40_s21 = sadd.s32 1, %s989_s14 }
   0x8   : > { %p33_p0 = scmp.ge.s32.totalorder %s31_s20, 2  ;;  %p47_p1 = scmp.ne.s32.totalorder %s989_s14, %s985_s13 }
   0x9   : > { %p48_p2 = scmp.eq.s32.totalorder %s1001_s17, 0  ;;  %p53_p3 = scmp.ne.s32.totalorder %s985_s13, %s981_s12 }
   0xa   : > { %s1372_s20 = smov (%p33_p0, %s31_s20), 0  ;;  %p54_p5 = scmp.eq.s32.totalorder %s739_s18, 0 }
   0xb   : > { %p1071_p4 = por %p48_p2, %p47_p1  ;;  %s35_s23 = ssub.s32 %s997_s16, %s1372_s20 }
   0xc   : > { %p121_p6 = scmp.eq.s32.totalorder %s739_s18, 1  ;;  %p38_p7 = scmp.eq.s32.totalorder %s35_s23, 0 }
   0xd   : > { %p1077_p8 = por %p54_p5, %p53_p3  ;;  %p127_p10 = scmp.eq.s32.totalorder %s740_s19, 1 }
   0xe   : > { %p1081_p9 = por %p121_p6, %p47_p1  ;;  %p824_p13 = scmp.lt.s32.totalorder %s1001_s17, 2 }
   0xf   : > { %s1086_s26 = scalar_select %p38_p7, %s989_s14, %s40_s21  }
  0x10   : > { %s1359_s25 = scalar_select %p1081_p9, 1, 0 }
  0x11   : > { %p1088_p11 = por %p127_p10, %p53_p3  ;;  %s153_s28 = sand.u32 1, %s989_s14  }
  0x12   : > { %s743_s29 = sshll.u32 %s153_s28, 7  ;;  %s786_s30 = sshll.u32 %s997_s16, 11 }
  0x13   : > { %s1360_s27 = scalar_select %p1088_p11, 1, 0 }
  0x14   : > { %s1099_s6 = scalar_lea.hbm %s1352_s0, %s786_s30  ;;  %s157_s7 = scalar_lea.vmem [#allocation2], %s743_s29 }
  0x15   : > { %s166_s8 = sshll.u32 %s157_s7, 4  ;;  %p1105_p0 = pnand %p824_p13, %p1071_p4  ;;  %s1101_s8 = int_to_ptr.vmem [resolvable:$true] %s166_s8 }
  0x16   : > { %s1110_s10 = scalar_lea.sflag [#allocation3], %s153_s28  ;;  %s889_s11 = scalar_lea.hbm %s1099_s6, 2048 }
  0x17   : > { %p890_p2 = scmp.ne.s32.totalorder %s1099_s6, %s889_s11  ;;  %p891_p3 = pneg %p1105_p0 }
  0x18   : > { %s894_s21 = scalar_lea.hbm %s1352_s0, 4096  ;;  %p895_p4 = scmp.lt.u32.totalorder %s1099_s6, %s1352_s0 }
  0x19   : > { %p892_p5 = pnand %p891_p3, %p890_p2  ;;  %p896_p7 = scmp.lt.u32.totalorder %s894_s21, %s889_s11 }
  0x1a   : > { %p898_p13 = scmp.lt.u32.totalorder %s889_s11, %s1099_s6 }
  0x1b   : > { %p893_p6 = pneg %p892_p5  ;;  %p897_p10 = por %p896_p7, %p895_p4 }
  0x1d   : > { %p899_p12 = por %p898_p13, %p897_p10 }
  0x1f   : > { %p900_p1 = pnand %p899_p12, %p893_p6 }
  0x21   : > { %903 = shalt.err (!%p900_p1)
}
  0x22   : > { %s904_s28 = scalar_lea.vmem %s1101_s8, 2048  ;;  %s1003_s29 = smov [#allocation2]  }
  0x23   : > { %p905_p2 = scmp.ne.s32.totalorder %s1101_s8, %s904_s28  ;;  %s909_s30 = sshll.u32 %s1003_s29, 4  ;;  %s910_s30 = int_to_ptr.vmem [resolvable:$false] %s909_s30 }
  0x24   : > { %s911_s4 = scalar_lea.vmem %s910_s30, 4096  ;;  %p912_p9 = scmp.lt.s32.totalorder %s1101_s8, %s910_s30 }
  0x25   : > { %p907_p5 = pnand %p905_p2, %p891_p3  ;;  %p913_p4 = scmp.lt.s32.totalorder %s911_s4, %s904_s28 }
  0x27   : > { %p908_p11 = pneg %p907_p5  ;;  %p914_p7 = por %p913_p4, %p912_p9 }
  0x29   : > { %p915_p10 = pnand %p914_p7, %p908_p11 }
  0x2b   : > { %918 = shalt.err (!%p915_p10)
}
  0x2c   : > { %s1004_s5 = smov 256   ;;  %s1005_s7 = smov 16  }
  0x2d   : > { %819 = dma.hbm_to_vmem [thread:$0]  (!%p1105_p0), %s1099_s6, 2048, %s1101_s8, %s1110_s10, %s1004_s5, %s1004_s5, %s1005_s7  }
  0x2e   : > { %p174_p12 = scmp.lt.s32.totalorder %s1001_s17, 3  ;;  %p1362_p1 = scmp.ge.s32.totalorder %s1001_s17, 1 }
  0x30   : > { %p175_p3 = pnand %p1362_p1, %p174_p12 }
  0x31   : > { %s1142_s11 = sand.u32 (!%p175_p3), 1, %s985_s13  }
  0x32   : > { %178 = sbr.rel (%p175_p3) target bundleno = 335 (0x14f), region = 32  ;;  %s747_s18 = sshll.u32 (!%p175_p3), %s1142_s11, 7 }
  0x33   : > { %s181_s19 = scalar_lea.sflag (!%p175_p3), [#allocation3], %s1142_s11  ;;  %s1148_s21 = scalar_lea.vmem (!%p175_p3), [#allocation2], %s747_s18 }
  0x39   : > { %972 = dma.done.wait (%p1077_p8), %s181_s19, 2048  }
  0x3a   : > { %974 = vsyncadd (%p1077_p8), %s181_s19, 4294965248  ;;  %v1006_v0 = vmov 0   ;;  %v211_v1 = vld [vmem:[%s1148_s21 + $0x8] sm:$0xff]  ;;  %v213_v2 = vld [vmem:[%s1148_s21 + $0x18] sm:$0xff]  ;;  %vm386_vm0 = vcmask 523264   ;;  %s1270_s9 = scalar_lea.vmem [#allocation5], %s747_s18 }
  0x3b   : > { %443 = vmatprep.mubr.bf16.mxu0 %v1006_v0  ;;  %483 = vmatprep.mubr.bf16.mxu1 %v1006_v0  ;;  %v210_v3 = vld [vmem:[%s1148_s21] sm:$0xff]  ;;  %v227_v4 = vpack.c.bf16 %v213_v2, %v211_v1  ;;  %v212_v5 = vld [vmem:[%s1148_s21 + $0x10] sm:$0xff]  ;;  %v215_v6 = vld [vmem:[%s1148_s21 + $0x28] sm:$0xff]  ;;  %s803_s18 = sshll.u32 %s993_s15, 11  ;;  %s652_s10 = sshll.u32 %s1270_s9, 4  ;;  %s1299_s10 = int_to_ptr.vmem [resolvable:$true] %s652_s10 }
  0x3c   : > { %880 = vset.pattern.permute.xlu1 %v1006_v0  ;;  %879 = vset.pattern.permute.xlu0 %v1006_v0  ;;  %v217_v7 = vld [vmem:[%s1148_s21 + $0x38] sm:$0xff]  ;;  %v226_v8 = vpack.c.bf16 %v212_v5, %v210_v3  ;;  %v214_v10 = vld [vmem:[%s1148_s21 + $0x20] sm:$0xff]  ;;  %v216_v11 = vld [vmem:[%s1148_s21 + $0x30] sm:$0xff]  ;;  %s1297_s28 = scalar_lea.hbm %s1355_s3, %s803_s18  ;;  %s637_s15 = scalar_lea.sflag [#allocation4], %s1142_s11 }
  0x3d   : > { %v229_v9 = vpack.c.bf16 %v217_v7, %v215_v6  ;;  %v219_v12 = vld [vmem:[%s1148_s21 + $0x48] sm:$0xff]  ;;  %411 = vmatprep.subr.bf16.mxu0 %v227_v4  ;;  %804 = vmatprep.subr.bf16.mxu1 %v227_v4  ;;  %v221_v13 = vld [vmem:[%s1148_s21 + $0x58] sm:$0xff]  ;;  %v228_v14 = vpack.c.bf16 %v216_v11, %v214_v10  ;;  %v218_v15 = vld [vmem:[%s1148_s21 + $0x40] sm:$0xff]  ;;  %s919_s29 = scalar_lea.vmem %s1299_s10, 2048  ;;  %p1363_p9 = scmp.ne.s32.totalorder %s1359_s25, 0 }
  0x3e   : > { %412 = vmatpush1.bf16.msra.mxu0 %v226_v8  ;;  %808 = vmatpush1.bf16.msra.mxu1 %v226_v8  ;;  %v220_v16 = vld [vmem:[%s1148_s21 + $0x50] sm:$0xff]  ;;  %v231_v17 = vpack.c.bf16 %v221_v13, %v219_v12  ;;  %v223_v18 = vld [vmem:[%s1148_s21 + $0x68] sm:$0xff]  ;;  %v225_v19 = vld [vmem:[%s1148_s21 + $0x78] sm:$0xff]  ;;  %p920_p8 = scmp.ne.s32.totalorder %s1299_s10, %s919_s29  ;;  %s1007_s30 = smov [#allocation5]  }
  0x3f   : > { %413 = vmatprep.subr.bf16.mxu0 %v229_v9  ;;  %805 = vmatprep.subr.bf16.mxu1 %v229_v9  ;;  %v230_v20 = vpack.c.bf16 %v220_v16, %v218_v15  ;;  %v222_v21 = vld [vmem:[%s1148_s21 + $0x60] sm:$0xff]  ;;  %v233_v22 = vpack.c.bf16 %v225_v19, %v223_v18  ;;  %v224_v23 = vld [vmem:[%s1148_s21 + $0x70] sm:$0xff]  ;;  %v253_v29 = vld [vmem:[%s1354_s2 + $0x18] sm:$0xff]  ;;  %s923_s4 = sshll.u32 %s1007_s30, 4  ;;  %s924_s4 = int_to_ptr.vmem [resolvable:$false] %s923_s4 }
  0x40   : > { %v232_v24 = vpack.c.bf16 %v224_v23, %v222_v21  ;;  %v252_v25 = vld [vmem:[%s1354_s2 + $0x10] sm:$0xff]  ;;  %v250_v26 = vld [vmem:[%s1354_s2] sm:$0xff]  ;;  %v251_v30 = vld [vmem:[%s1354_s2 + $0x8] sm:$0xff]  ;;  %p921_p11 = pnand %p920_p8, %p1363_p9  ;;  %s925_s5 = scalar_lea.vmem %s924_s4, 4096 }
  0x41   : > { %v881_v27 = vld [vmem:[%s1353_s1] sm:$0xff]   ;;  %278 = vperm.xlu1 %880, %v252_v25   ;;  %268 = vperm.xlu0 %879, %v250_v26   ;;  %v255_v31 = vld [vmem:[%s1354_s2 + $0x28] sm:$0xff]  ;;  %v257_v35 = vld [vmem:[%s1354_s2 + $0x38] sm:$0xff]  ;;  %p926_p6 = scmp.lt.s32.totalorder %s1299_s10, %s924_s4  ;;  %p927_p13 = scmp.lt.s32.totalorder %s925_s5, %s919_s29 }
  0x42   : > { %414 = vmatpush1.bf16.msra.mxu0 %v228_v14  ;;  %809 = vmatpush1.bf16.msra.mxu1 %v228_v14  ;;  %v882_v28 = vld [vmem:[%s1353_s1 + $0x20] sm:$0xff]   ;;  %v883_v33 = vld [vmem:[%s1353_s1 + $0x8] sm:$0xff]   ;;  %v256_v36 = vld [vmem:[%s1354_s2 + $0x30] sm:$0xff]  ;;  %p922_p0 = pneg %p921_p11 }
  0x43   : > { %415 = vmatprep.subr.bf16.mxu0 %v231_v17  ;;  %806 = vmatprep.subr.bf16.mxu1 %v231_v17  ;;  %v254_v32 = vld [vmem:[%s1354_s2 + $0x20] sm:$0xff]  ;;  %v884_v34 = vld [vmem:[%s1353_s1 + $0x28] sm:$0xff]   ;;  %v885_v39 = vld [vmem:[%s1353_s1 + $0x10] sm:$0xff]   ;;  %p928_p2 = por %p927_p13, %p926_p6 }
  0x44   : > { %v259_v37 = vld [vmem:[%s1354_s2 + $0x48] sm:$0xff]  ;;  %v258_v38 = vld [vmem:[%s1354_s2 + $0x40] sm:$0xff]  ;;  %v886_v40 = vld [vmem:[%s1353_s1 + $0x30] sm:$0xff]  }
  0x45   : > { %283 = vperm.xlu1 %880, %v253_v29   ;;  %273 = vperm.xlu0 %879, %v251_v30   ;;  %v261_v41 = vld [vmem:[%s1354_s2 + $0x58] sm:$0xff]  ;;  %v260_v42 = vld [vmem:[%s1354_s2 + $0x50] sm:$0xff]  ;;  %v263_v43 = vld [vmem:[%s1354_s2 + $0x68] sm:$0xff]  ;;  %p929_p5 = pnand %p928_p2, %p922_p0 }
  0x46   : > { %416 = vmatpush1.bf16.msra.mxu0 %v230_v20  ;;  %810 = vmatpush1.bf16.msra.mxu1 %v230_v20  ;;  %v262_v44 = vld [vmem:[%s1354_s2 + $0x60] sm:$0xff]  ;;  %v887_v45 = vld [vmem:[%s1353_s1 + $0x18] sm:$0xff]   ;;  %v264_v48 = vld [vmem:[%s1354_s2 + $0x70] sm:$0xff] }
  0x47   : > { %417 = vmatprep.subr.bf16.mxu0 %v233_v22  ;;  %807 = vmatprep.subr.bf16.mxu1 %v233_v22  ;;  %v888_v46 = vld [vmem:[%s1353_s1 + $0x38] sm:$0xff]  }
  0x48   : > { %v265_v47 = vld [vmem:[%s1354_s2 + $0x78] sm:$0xff] }
  0x49   : > { %293 = vperm.xlu1 %880, %v255_v31   ;;  %288 = vperm.xlu0 %879, %v254_v32  }
  0x4a   : > { %418 = vmatpush1.bf16.msra.mxu0 %v232_v24  ;;  %811 = vmatpush1.bf16.msra.mxu1 %v232_v24 }
  0x4d   : > { %757 = vmatmul.mubr.msk.bf16.vlgmr.msra.gmra.mrb[0].mxu0 %vm386_vm0, %v881_v27  ;;  %761 = vmatmul.mubr.msk.bf16.vlgmr.msra.gmra.mrb[0].mxu1 %vm386_vm0, %v882_v28 }
  0x4e   : > { %453 = vmatprep.mubr.bf16.mxu0 %v1006_v0  ;;  %493 = vmatprep.mubr.bf16.mxu1 %v1006_v0 }
  0x4f   : > { %303 = vperm.xlu1 %880, %v257_v35   ;;  %298 = vperm.xlu0 %879, %v256_v36  }
  0x53   : > { %313 = vperm.xlu1 %880, %v259_v37   ;;  %308 = vperm.xlu0 %879, %v258_v38  }
  0x55   : > { %758 = vmatmul.mubr.msk.bf16.gmra.mrb[4].mxu0 %vm386_vm0, %v883_v33  ;;  %762 = vmatmul.mubr.msk.bf16.gmra.mrb[4].mxu1 %vm386_vm0, %v884_v34 }
  0x56   : > { %463 = vmatprep.mubr.bf16.mxu0 %v1006_v0  ;;  %503 = vmatprep.mubr.bf16.mxu1 %v1006_v0 }
  0x57   : > { %323 = vperm.xlu1 %880, %v261_v41   ;;  %318 = vperm.xlu0 %879, %v260_v42  }
  0x5b   : > { %333 = vperm.xlu1 %880, %v263_v43   ;;  %328 = vperm.xlu0 %879, %v262_v44  }
  0x5d   : > { %759 = vmatmul.mubr.msk.bf16.gmra.mrb[8].mxu0 %vm386_vm0, %v885_v39  ;;  %763 = vmatmul.mubr.msk.bf16.gmra.mrb[8].mxu1 %vm386_vm0, %v886_v40 }
  0x5e   : > { %473 = vmatprep.mubr.bf16.mxu0 %v1006_v0  ;;  %513 = vmatprep.mubr.bf16.mxu1 %v1006_v0 }
  0x5f   : > { %343 = vperm.xlu1 %880, %v265_v47   ;;  %338 = vperm.xlu0 %879, %v264_v48  }
  0x65   : > { %760 = vmatmul.mubr.msk.bf16.gmra.mrb[12].mxu0 %vm386_vm0, %v887_v45  ;;  %764 = vmatmul.mubr.msk.bf16.gmra.mrb[12].mxu1 %vm386_vm0, %v888_v46 }
  0xc0   : > { %v279_v49 = vpop.permute.xlu1 %278  ;;  %v269_v50 = vpop.permute.xlu0 %268 }
  0xc4   : > { %v284_v51 = vpop.permute.xlu1 %283  ;;  %v274_v52 = vpop.permute.xlu0 %273 }
  0xc8   : > { %v1260_v53 = vpop.permute.xlu1 %293  ;;  %v1262_v54 = vpop.permute.xlu0 %288 }
  0xce   : > { %v1264_v55 = vpop.permute.xlu1 %303  ;;  %v1266_v56 = vpop.permute.xlu0 %298 }
  0xd2   : > { %v314_v57 = vpop.permute.xlu1 %313  ;;  %v309_v58 = vpop.permute.xlu0 %308 }
  0xd6   : > { %v324_v15 = vpop.permute.xlu1 %323  ;;  %v319_v16 = vpop.permute.xlu0 %318 }
  0xda   : > { %v334_v37 = vpop.permute.xlu1 %333  ;;  %v329_v38 = vpop.permute.xlu0 %328 }
 0x120   : > { %v445_v59 = vpop.f32.mrb[0].mxu0  ;;  %v485_v60 = vpop.f32.mrb[0].mxu1 }
 0x121   : > { %v446_v61 = vadd.f32 %v445_v59, %v269_v50  ;;  %v486_v62 = vadd.f32 %v485_v60, %v309_v58  ;;  %v447_v63 = vpop.f32.mrb[1].mxu0  ;;  %v487_v0 = vpop.f32.mrb[1].mxu1 }
 0x122   : > { %v448_v1 = vadd.f32 %v447_v63, %v269_v50  ;;  %v488_v2 = vadd.f32 %v487_v0, %v309_v58  ;;  %v449_v3 = vpop.f32.mrb[2].mxu0  ;;  %v489_v4 = vpop.f32.mrb[2].mxu1 }
 0x123   : > { %v450_v5 = vadd.f32 %v449_v3, %v274_v52  ;;  %v490_v6 = vadd.f32 %v489_v4, %v314_v57  ;;  %v451_v7 = vpop.f32.mrb[3].mxu0  ;;  %v491_v8 = vpop.f32.mrb[3].mxu1 }
 0x124   : > { %v787_v9 = vpack.c.bf16 %v448_v1, %v446_v61  ;;  %v795_v10 = vpack.c.bf16 %v488_v2, %v486_v62  ;;  %v452_v11 = vadd.f32 %v451_v7, %v274_v52  ;;  %v492_v12 = vadd.f32 %v491_v8, %v314_v57  ;;  %v344_v62 = vpop.permute.xlu1 %343  ;;  %v339_v63 = vpop.permute.xlu0 %338 }
 0x126   : > { %620 = vst [vmem:[%s1270_s9] sm:$0xff] %v787_v9  ;;  %628 = vst [vmem:[%s1270_s9 + $0x40] sm:$0xff] %v795_v10  ;;  %v788_v13 = vpack.c.bf16 %v452_v11, %v450_v5  ;;  %v796_v14 = vpack.c.bf16 %v492_v12, %v490_v6 }
 0x128   : > { %621 = vst [vmem:[%s1270_s9 + $0x8] sm:$0xff] %v788_v13  ;;  %629 = vst [vmem:[%s1270_s9 + $0x48] sm:$0xff] %v796_v14  ;;  %v455_v17 = vpop.f32.mrb[4].mxu0  ;;  %v495_v18 = vpop.f32.mrb[4].mxu1 }
 0x129   : > { %v456_v19 = vadd.f32 %v455_v17, %v279_v49  ;;  %v496_v20 = vadd.f32 %v495_v18, %v319_v16  ;;  %v457_v21 = vpop.f32.mrb[5].mxu0  ;;  %v497_v22 = vpop.f32.mrb[5].mxu1 }
 0x12a   : > { %v458_v23 = vadd.f32 %v457_v21, %v279_v49  ;;  %v498_v24 = vadd.f32 %v497_v22, %v319_v16  ;;  %v459_v25 = vpop.f32.mrb[6].mxu0  ;;  %v499_v26 = vpop.f32.mrb[6].mxu1 }
 0x12b   : > { %v460_v27 = vadd.f32 %v459_v25, %v284_v51  ;;  %v500_v28 = vadd.f32 %v499_v26, %v324_v15  ;;  %v461_v29 = vpop.f32.mrb[7].mxu0  ;;  %v501_v30 = vpop.f32.mrb[7].mxu1 }
 0x12c   : > { %v789_v31 = vpack.c.bf16 %v458_v23, %v456_v19  ;;  %v797_v32 = vpack.c.bf16 %v498_v24, %v496_v20  ;;  %v462_v33 = vadd.f32 %v461_v29, %v284_v51  ;;  %v502_v34 = vadd.f32 %v501_v30, %v324_v15 }
 0x12e   : > { %622 = vst [vmem:[%s1270_s9 + $0x10] sm:$0xff] %v789_v31  ;;  %630 = vst [vmem:[%s1270_s9 + $0x50] sm:$0xff] %v797_v32  ;;  %v790_v35 = vpack.c.bf16 %v462_v33, %v460_v27  ;;  %v798_v36 = vpack.c.bf16 %v502_v34, %v500_v28 }
 0x130   : > { %623 = vst [vmem:[%s1270_s9 + $0x18] sm:$0xff] %v790_v35  ;;  %631 = vst [vmem:[%s1270_s9 + $0x58] sm:$0xff] %v798_v36  ;;  %v465_v39 = vpop.f32.mrb[8].mxu0  ;;  %v505_v40 = vpop.f32.mrb[8].mxu1 }
 0x131   : > { %v466_v41 = vadd.f32 %v465_v39, %v1262_v54  ;;  %v506_v42 = vadd.f32 %v505_v40, %v329_v38  ;;  %v467_v43 = vpop.f32.mrb[9].mxu0  ;;  %v507_v44 = vpop.f32.mrb[9].mxu1 }
 0x132   : > { %v468_v45 = vadd.f32 %v467_v43, %v1262_v54  ;;  %v508_v46 = vadd.f32 %v507_v44, %v329_v38  ;;  %v469_v47 = vpop.f32.mrb[10].mxu0  ;;  %v509_v48 = vpop.f32.mrb[10].mxu1 }
 0x133   : > { %v470_v49 = vadd.f32 %v469_v47, %v1260_v53  ;;  %v510_v50 = vadd.f32 %v509_v48, %v334_v37  ;;  %v471_v51 = vpop.f32.mrb[11].mxu0  ;;  %v511_v52 = vpop.f32.mrb[11].mxu1 }
 0x134   : > { %v791_v57 = vpack.c.bf16 %v468_v45, %v466_v41  ;;  %v799_v58 = vpack.c.bf16 %v508_v46, %v506_v42  ;;  %v472_v59 = vadd.f32 %v471_v51, %v1260_v53  ;;  %v512_v60 = vadd.f32 %v511_v52, %v334_v37 }
 0x136   : > { %624 = vst [vmem:[%s1270_s9 + $0x20] sm:$0xff] %v791_v57  ;;  %632 = vst [vmem:[%s1270_s9 + $0x60] sm:$0xff] %v799_v58  ;;  %v792_v61 = vpack.c.bf16 %v472_v59, %v470_v49  ;;  %v800_v54 = vpack.c.bf16 %v512_v60, %v510_v50 }
 0x138   : > { %625 = vst [vmem:[%s1270_s9 + $0x28] sm:$0xff] %v792_v61  ;;  %633 = vst [vmem:[%s1270_s9 + $0x68] sm:$0xff] %v800_v54  ;;  %v475_v0 = vpop.f32.mrb[12].mxu0  ;;  %v515_v1 = vpop.f32.mrb[12].mxu1 }
 0x139   : > { %v476_v2 = vadd.f32 %v475_v0, %v1266_v56  ;;  %v516_v3 = vadd.f32 %v515_v1, %v339_v63  ;;  %v477_v4 = vpop.f32.mrb[13].mxu0  ;;  %v517_v5 = vpop.f32.mrb[13].mxu1 }
 0x13a   : > { %v478_v53 = vadd.f32 %v477_v4, %v1266_v56  ;;  %v518_v6 = vadd.f32 %v517_v5, %v339_v63  ;;  %v479_v7 = vpop.f32.mrb[14].mxu0  ;;  %v519_v8 = vpop.f32.mrb[14].mxu1 }
 0x13b   : > { %v480_v9 = vadd.f32 %v479_v7, %v1264_v55  ;;  %v520_v10 = vadd.f32 %v519_v8, %v344_v62  ;;  %v481_v11 = vpop.f32.mrb[15].mxu0  ;;  %v521_v12 = vpop.f32.mrb[15].mxu1 }
 0x13c   : > { %v793_v13 = vpack.c.bf16 %v478_v53, %v476_v2  ;;  %v801_v14 = vpack.c.bf16 %v518_v6, %v516_v3  ;;  %v482_v56 = vadd.f32 %v481_v11, %v1264_v55  ;;  %v522_v15 = vadd.f32 %v521_v12, %v344_v62 }
 0x13e   : > { %626 = vst [vmem:[%s1270_s9 + $0x30] sm:$0xff] %v793_v13  ;;  %634 = vst [vmem:[%s1270_s9 + $0x70] sm:$0xff] %v801_v14  ;;  %v794_v16 = vpack.c.bf16 %v482_v56, %v480_v9  ;;  %v802_v17 = vpack.c.bf16 %v522_v15, %v520_v10 }
 0x140   : > { %627 = vst [vmem:[%s1270_s9 + $0x38] sm:$0xff] %v794_v16  ;;  %635 = vst [vmem:[%s1270_s9 + $0x78] sm:$0xff] %v802_v17 }
 0x141   : > { %932 = shalt.err (!%p929_p5)
}
 0x142   : > { %s933_s7 = scalar_lea.hbm %s1297_s28, 2048  ;;  %s937_s24 = scalar_lea.hbm %s1355_s3, 4096 }
 0x143   : > { %p934_p4 = scmp.ne.s32.totalorder %s1297_s28, %s933_s7  ;;  %p938_p12 = scmp.lt.u32.totalorder %s1297_s28, %s1355_s3 }
 0x144   : > { %p939_p1 = scmp.lt.u32.totalorder %s937_s24, %s933_s7  ;;  %p941_p8 = scmp.lt.u32.totalorder %s933_s7, %s1297_s28 }
 0x145   : > { %p935_p7 = pnand %p934_p4, %p1363_p9 }
 0x146   : > { %p940_p3 = por %p939_p1, %p938_p12 }
 0x147   : > { %p936_p10 = pneg %p935_p7 }
 0x148   : > { %p942_p11 = por %p941_p8, %p940_p3 }
 0x14a   : > { %p943_p0 = pnand %p942_p11, %p936_p10 }
 0x14c   : > { %946 = shalt.err (!%p943_p0)
}
 0x14d   : > { %s1008_s9 = smov 128   ;;  %s1009_s18 = smov 8  }
 0x14e   : > { %814 = dma.vmem_to_hbm [thread:$0]  (%p1363_p9), %s1299_s10, 2048, %s1297_s28, %s637_s15, %s1008_s9, %s1008_s9, %s1009_s18  }
 0x14f PF: > { %s667_s22 = sand.u32 1, %s981_s12   ;;  %p1364_p6 = scmp.ne.s32.totalorder %s1360_s27, 0 }
 0x150   : > { %p1365_p13 = scmp.ge.s32.totalorder %s1001_s17, 2  ;;  %s668_s23 = scalar_lea.sflag [#allocation4], %s667_s22 }
 0x152   : > { %p821_p2 = pnand %p1365_p13, %p1364_p6 }
 0x154   : > { %976 = dma.done.wait (!%p821_p2), %s668_s23, 2048  }
 0x155   : > { %978 = vsyncadd (!%p821_p2), %s668_s23, 4294965248  ;;  %s19_s17 = sadd.s32 1, %s1001_s17   ;;  %s1366_s12 = smov %s985_s13 }
 0x156   : > { %p16_p5 = scmp.ge.s32.totalorder %s19_s17, 4   ;;  %s1367_s13 = smov %s989_s14 }
 0x157   : > { %s1368_s14 = smov %s1086_s26  ;;  %s1369_s15 = smov %s997_s16 }
 0x158   : > { %s1370_s16 = smov %s1372_s20  ;;  %18 = sbr.rel (!%p16_p5) target bundleno = 6 (0x6), region = 77 }
 0x15f   :  { %673 = vsyncpa [#allocation3], 1 }
 0x160   :  { %675 = vsyncpa [#allocation3 + $0x1], 1 }
 0x161   :  { %676 = vsyncpa [#allocation4], 1 }
 0x162   :  { %678 = vsyncpa [#allocation4 + $0x1], 1 }

</bundles_post_ra>
